<compile_context>
chip_gen: v5e
topology: v5e:2x2
jax: 0.10.0
libtpu: 0.0.40
codegen_flags: <defaults>
</compile_context>

<pallas_src>
import functools

import jax
import jax.numpy as jnp
from jax.experimental import pallas as pl
from jax.experimental.pallas import tpu as pltpu

LANE = 128


def _cdiv(a, b):
    return (a + b - 1) // b


def _round_up(a, b):
    return _cdiv(a, b) * b


def _default_num_splits():
    # 2 TensorCores per chip on v7x (the leading "parallel" grid axis shards
    # across them); single-TC v5e/v6e get 1 so the outer axis disappears.
    try:
        kind = jax.devices()[0].device_kind.lower()
    except Exception:
        return 1
    return 2 if "v7" in kind else 1


def _focal_loss_kernel(preds_ref, labels_ref, out_ref, acc_ref, *,
                       alpha_vec, gamma, num_classes):
    i = pl.program_id(1)
    n_i = pl.num_programs(1)

    @pl.when(i == 0)
    def _():
        acc_ref[...] = jnp.zeros_like(acc_ref)

    lbl = labels_ref[...]                    # (r_tile, 128) int32; -1 = padding

    # Per-class planes: the class axis is small & static, so all "axis=C"
    # reductions are a few full-width dense VPU max/adds — no XLU reductions.
    rows = [preds_ref[c].astype(jnp.float32) for c in range(num_classes)]
    m = rows[0]
    for c in range(1, num_classes):
        m = jnp.maximum(m, rows[c])
    zs = [r - m for r in rows]               # stable shifted logits
    ezs = [jnp.exp(z) for z in zs]
    s = ezs[0]
    for c in range(1, num_classes):
        s = s + ezs[c]
    log_s = jnp.log(s)

    # Gather at the label via a static where-chain; alpha entries are closure
    # constants (no alpha input stream, no one-hot broadcast-multiply).
    z_t = zs[0]
    e_t = ezs[0]
    alpha_t = jnp.full_like(m, alpha_vec[0])
    for c in range(1, num_classes):
        is_c = lbl == c
        z_t = jnp.where(is_c, zs[c], z_t)
        e_t = jnp.where(is_c, ezs[c], e_t)
        alpha_t = jnp.where(is_c, alpha_vec[c], alpha_t)

    logp_t = z_t - log_s                     # log-softmax at the label
    p_t = e_t / s                            # softmax at the label (reuses exp(z))
    one_minus_p = 1.0 - p_t

    # (1 - p)**gamma: multiply chain for integer gamma (gamma=2 -> one VPU
    # mul) instead of exp/log on the EUP; general pow fallback otherwise.
    if float(gamma).is_integer():
        g = int(gamma)
        if g <= 0:
            mod = jnp.ones_like(one_minus_p)
        else:
            mod = one_minus_p
            for _ in range(g - 1):
                mod = mod * one_minus_p
    else:
        mod = jnp.power(one_minus_p, float(gamma))

    loss = -alpha_t * mod * logp_t           # (r_tile, 128)
    # Sentinel-label padding mask (padded rows carry label -1).
    # TODO(synk): out-of-range "ignore" labels (>= num_classes) fall through to
    # class 0 like the original where-chain; the torch gather would error.
    loss = jnp.where(lbl >= 0, loss, 0.0)

    # Fold the tile down to one (8,128) accumulator vreg with plain VPU adds;
    # the single cross-lane reduce happens once per outer split in finalize.
    r_tile, lane = loss.shape
    acc_ref[...] += loss.reshape(r_tile // 8, 8, lane).sum(axis=0)

    @pl.when(i == n_i - 1)
    def _():
        out_ref[...] = jnp.sum(acc_ref[...]).reshape(1, 1, 1)


def focal_loss_pallas(preds, labels, *, alpha=0.001, gamma=2, num_classes=3,
                      size_average=False, r_tile=1024, num_splits=None):
    """Matches focal_loss.forward: preds [B,N,C] or [B,C], labels [B,N] or [B]."""
    # --- parameter setup (mirrors __init__) ---
    if isinstance(alpha, (list, tuple)):
        assert len(alpha) == num_classes
        alpha_vec = tuple(float(a) for a in alpha)
    else:
        assert alpha < 1
        alpha_vec = (float(alpha),) + (float(1.0 - alpha),) * (num_classes - 1)

    if num_splits is None:
        num_splits = _default_num_splits()
    num_splits = max(1, int(num_splits))

    C = preds.shape[-1]
    assert C == num_classes

    # Keep the caller's float dtype (bf16 stays bf16 through pad/transpose and
    # into the kernel's DMA stream); cast to f32 only inside the kernel.
    if not jnp.issubdtype(preds.dtype, jnp.floating):
        preds = preds.astype(jnp.float32)
    preds2d = preds.reshape(-1, C)
    labels1d = labels.reshape(-1).astype(jnp.int32)
    M = preds2d.shape[0]

    # Dense row tiling: r_tile lane-rows x 128 lanes per step (multiple of 8),
    # shrunk for small inputs so we don't over-pad.
    lane_rows = _cdiv(M, LANE)
    r_tile_eff = max(8, min(int(r_tile), _round_up(_cdiv(lane_rows, num_splits), 8)))
    chunk_rows = num_splits * r_tile_eff
    steps = _cdiv(lane_rows, chunk_rows)
    rows_pad = steps * chunk_rows
    M_pad = rows_pad * LANE

    if M_pad != M:
        preds2d = jnp.pad(preds2d, ((0, M_pad - M), (0, 0)))
        labels1d = jnp.pad(labels1d, (0, M_pad - M), constant_values=-1)

    # One transpose to the final lane-dense layout:
    #   preds_t[c, r, l] = preds2d[r*128 + l, c]
    preds_t = preds2d.reshape(rows_pad, LANE, C).transpose(2, 0, 1)  # (C, rows_pad, 128)
    labels_t = labels1d.reshape(rows_pad, LANE)                      # (rows_pad, 128)

    kernel = functools.partial(_focal_loss_kernel, alpha_vec=alpha_vec,
                               gamma=gamma, num_classes=num_classes)

    partials = pl.pallas_call(
        kernel,
        out_shape=jax.ShapeDtypeStruct((num_splits, 1, 1), jnp.float32),
        grid_spec=pltpu.PrefetchScalarGridSpec(
            num_scalar_prefetch=0,
            grid=(num_splits, steps),
            in_specs=[
                # preds tile: (C, r_tile, 128) — dense sublane x lane rows
                pl.BlockSpec((C, r_tile_eff, LANE),
                             lambda c, i: (0, c * steps + i, 0)),
                # labels tile: (r_tile, 128) int32
                pl.BlockSpec((r_tile_eff, LANE),
                             lambda c, i: (c * steps + i, 0)),
            ],
            # one scalar partial per outer split (resident across inner axis)
            out_specs=pl.BlockSpec((1, 1, 1), lambda c, i: (c, 0, 0)),
            scratch_shapes=[pltpu.VMEM((8, LANE), jnp.float32)],
        ),
        compiler_params=pltpu.CompilerParams(
            dimension_semantics=("parallel", "arbitrary")),
    )(preds_t, labels_t)

    loss = jnp.sum(partials)
    if size_average:
        loss = loss / M
    return loss


def _focal_loss_ref(preds, labels, *, alpha=0.001, gamma=2, num_classes=3,
                    size_average=False):
    if isinstance(alpha, (list, tuple)):
        alpha_vec = jnp.array(alpha, dtype=jnp.float32)
    else:
        alpha_vec = jnp.concatenate([
            jnp.array([alpha], dtype=jnp.float32),
            jnp.full((num_classes - 1,), 1.0 - alpha, dtype=jnp.float32),
        ])
    preds2d = preds.reshape(-1, preds.shape[-1]).astype(jnp.float32)
    labels1d = labels.reshape(-1)
    p = jax.nn.softmax(preds2d, axis=1)
    logp = jnp.log(p)
    p_t = jnp.take_along_axis(p, labels1d[:, None], axis=1)[:, 0]
    logp_t = jnp.take_along_axis(logp, labels1d[:, None], axis=1)[:, 0]
    a_t = alpha_vec[labels1d]
    loss = -a_t * jnp.power(1.0 - p_t, gamma) * logp_t
    return loss.mean() if size_average else loss.sum()


if __name__ == "__main__":
    key = jax.random.PRNGKey(0)
    B, N, C = 2, 8, 3                      # detection-style [B, N, C] input
    k1, k2, k3, k4 = jax.random.split(key, 4)
    preds = jax.random.normal(k1, (B, N, C), dtype=jnp.float32)
    labels = jax.random.randint(k2, (B, N), 0, C, dtype=jnp.int32)

    loss = focal_loss_pallas(preds, labels, alpha=0.001, gamma=2,
                             num_classes=C, size_average=False)
    loss = jax.block_until_ready(loss)
    ref = _focal_loss_ref(preds, labels, alpha=0.001, gamma=2,
                          num_classes=C, size_average=False)
    assert jnp.allclose(loss, ref, rtol=1e-5, atol=1e-5), (loss, ref)

    # Classification-style [B, C] input, mean reduction, list alpha.
    B2 = 5
    preds2 = jax.random.normal(k3, (B2, C), dtype=jnp.float32)
    labels2 = jax.random.randint(k4, (B2,), 0, C, dtype=jnp.int32)
    alpha_list = [0.25, 0.5, 0.25]
    loss2 = focal_loss_pallas(preds2, labels2, alpha=alpha_list, gamma=2,
                              num_classes=C, size_average=True)
    loss2 = jax.block_until_ready(loss2)
    ref2 = _focal_loss_ref(preds2, labels2, alpha=alpha_list, gamma=2,
                           num_classes=C, size_average=True)
    assert jnp.allclose(loss2, ref2, rtol=1e-5, atol=1e-5), (loss2, ref2)

    print("KERNEL_OK")
</pallas_src>

<mosaic_0001>
module attributes {stable_mosaic.version = 11 : i64} {
  func.func @_focal_loss_kernel(%arg0: i32, %arg1: i32, %arg2: memref<3x8x128xf32, #tpu.memory_space<vmem>>, %arg3: memref<8x128xi32, #tpu.memory_space<vmem>>, %arg4: memref<1x1x1xf32, #tpu.memory_space<vmem>>, %arg5: memref<8x128xf32, #tpu.memory_space<vmem>>) attributes {dimension_semantics = [#tpu.dimension_semantics<parallel>, #tpu.dimension_semantics<arbitrary>], iteration_bounds = array<i64: 1, 1>, scalar_prefetch = 0 : i64, scratch_operands = 1 : i64, tpu.core_type = #tpu.core_type<tc>, window_params = [{transform_indices = @transform_0, window_bounds = array<i64: 3, 8, 128>}, {transform_indices = @transform_1, window_bounds = array<i64: 8, 128>}, {transform_indices = @transform_2, window_bounds = array<i64: 1, 1, 1>}]} {
    %c0_i32 = arith.constant 0 : i32
    %0 = arith.cmpi eq, %arg1, %c0_i32 : i32
    %1 = arith.extui %0 : i1 to i32
    %c0_i32_0 = arith.constant 0 : i32
    %2 = arith.cmpi ne, %1, %c0_i32_0 : i32
    scf.if %2 {
      %cst_22 = arith.constant 0.000000e+00 : f32
      %55 = vector.broadcast %cst_22 : f32 to vector<8x128xf32>
      %c0_23 = arith.constant 0 : index
      %c0_24 = arith.constant 0 : index
      %56 = vector.load %arg5[%c0_23, %c0_24] : memref<8x128xf32, #tpu.memory_space<vmem>>, vector<8x128xf32>
      tpu.vector_store %arg5[%c0_23, %c0_24], %55 {strides = array<i32>} : memref<8x128xf32, #tpu.memory_space<vmem>>, vector<8x128xf32>,
    } else {
    }
    %c0 = arith.constant 0 : index
    %c0_1 = arith.constant 0 : index
    %3 = vector.load %arg3[%c0, %c0_1] : memref<8x128xi32, #tpu.memory_space<vmem>>, vector<8x128xi32>
    %c0_2 = arith.constant 0 : index
    %c0_3 = arith.constant 0 : index
    %c0_4 = arith.constant 0 : index
    %4 = vector.load %arg2[%c0_2, %c0_3, %c0_4] : memref<3x8x128xf32, #tpu.memory_space<vmem>>, vector<1x8x128xf32>
    %5 = vector.shape_cast %4 : vector<1x8x128xf32> to vector<8x128xf32>
    %c1 = arith.constant 1 : index
    %c0_5 = arith.constant 0 : index
    %c0_6 = arith.constant 0 : index
    %6 = vector.load %arg2[%c1, %c0_5, %c0_6] : memref<3x8x128xf32, #tpu.memory_space<vmem>>, vector<1x8x128xf32>
    %7 = vector.shape_cast %6 : vector<1x8x128xf32> to vector<8x128xf32>
    %c2 = arith.constant 2 : index
    %c0_7 = arith.constant 0 : index
    %c0_8 = arith.constant 0 : index
    %8 = vector.load %arg2[%c2, %c0_7, %c0_8] : memref<3x8x128xf32, #tpu.memory_space<vmem>>, vector<1x8x128xf32>
    %9 = vector.shape_cast %8 : vector<1x8x128xf32> to vector<8x128xf32>
    %10 = arith.maximumf %5, %7 : vector<8x128xf32>
    %11 = arith.maximumf %10, %9 : vector<8x128xf32>
    %12 = arith.subf %5, %11 : vector<8x128xf32>
    %13 = arith.subf %7, %11 : vector<8x128xf32>
    %14 = arith.subf %9, %11 : vector<8x128xf32>
    %15 = math.exp %12 : vector<8x128xf32>
    %16 = math.exp %13 : vector<8x128xf32>
    %17 = math.exp %14 : vector<8x128xf32>
    %18 = arith.addf %15, %16 : vector<8x128xf32>
    %19 = arith.addf %18, %17 : vector<8x128xf32>
    %20 = math.log %19 : vector<8x128xf32>
    %cst = arith.constant 1.000000e-03 : f32
    %21 = vector.broadcast %cst : f32 to vector<8x128xf32>
    %c1_i32 = arith.constant 1 : i32
    %22 = vector.broadcast %c1_i32 : i32 to vector<8x128xi32>
    %23 = arith.cmpi eq, %3, %22 : vector<8x128xi32>
    %24 = arith.select %23, %13, %12 : vector<8x128xi1>, vector<8x128xf32>
    %25 = arith.select %23, %16, %15 : vector<8x128xi1>, vector<8x128xf32>
    %cst_9 = arith.constant 9.990000e-01 : f32
    %26 = vector.broadcast %cst_9 : f32 to vector<8x128xf32>
    %27 = arith.select %23, %26, %21 : vector<8x128xi1>, vector<8x128xf32>
    %c2_i32 = arith.constant 2 : i32
    %28 = vector.broadcast %c2_i32 : i32 to vector<8x128xi32>
    %29 = arith.cmpi eq, %3, %28 : vector<8x128xi32>
    %30 = arith.select %29, %14, %24 : vector<8x128xi1>, vector<8x128xf32>
    %31 = arith.select %29, %17, %25 : vector<8x128xi1>, vector<8x128xf32>
    %cst_10 = arith.constant 9.990000e-01 : f32
    %32 = vector.broadcast %cst_10 : f32 to vector<8x128xf32>
    %33 = arith.select %29, %32, %27 : vector<8x128xi1>, vector<8x128xf32>
    %34 = arith.subf %30, %20 : vector<8x128xf32>
    %35 = arith.divf %31, %19 : vector<8x128xf32>
    %cst_11 = arith.constant 1.000000e+00 : f32
    %36 = vector.broadcast %cst_11 : f32 to vector<8x128xf32>
    %37 = arith.subf %36, %35 : vector<8x128xf32>
    %38 = arith.mulf %37, %37 : vector<8x128xf32>
    %cst_12 = arith.constant 0.000000e+00 : f32
    %39 = vector.broadcast %cst_12 : f32 to vector<8x128xf32>
    %40 = arith.subf %39, %33 : vector<8x128xf32>
    %41 = arith.mulf %40, %38 : vector<8x128xf32>
    %42 = arith.mulf %41, %34 : vector<8x128xf32>
    %c0_i32_13 = arith.constant 0 : i32
    %43 = vector.broadcast %c0_i32_13 : i32 to vector<8x128xi32>
    %44 = arith.cmpi sge, %3, %43 : vector<8x128xi32>
    %cst_14 = arith.constant 0.000000e+00 : f32
    %45 = vector.broadcast %cst_14 : f32 to vector<8x128xf32>
    %46 = arith.select %44, %42, %45 : vector<8x128xi1>, vector<8x128xf32>
    %c0_15 = arith.constant 0 : index
    %c0_16 = arith.constant 0 : index
    %47 = vector.load %arg5[%c0_15, %c0_16] : memref<8x128xf32, #tpu.memory_space<vmem>>, vector<8x128xf32>
    %48 = vector.shape_cast %46 : vector<8x128xf32> to vector<1x8x128xf32>
    %cst_17 = arith.constant dense<0.000000e+00> : vector<8x128xf32>
    %49 = vector.multi_reduction <add>, %48, %cst_17 [0] : vector<1x8x128xf32> to vector<8x128xf32>
    %50 = arith.addf %47, %49 : vector<8x128xf32>
    %c0_18 = arith.constant 0 : index
    %c0_19 = arith.constant 0 : index
    %51 = vector.load %arg5[%c0_18, %c0_19] : memref<8x128xf32, #tpu.memory_space<vmem>>, vector<8x128xf32>
    tpu.vector_store %arg5[%c0_18, %c0_19], %50 {strides = array<i32>} : memref<8x128xf32, #tpu.memory_space<vmem>>, vector<8x128xf32>,
    %c0_i32_20 = arith.constant 0 : i32
    %52 = arith.cmpi eq, %arg1, %c0_i32_20 : i32
    %53 = arith.extui %52 : i1 to i32
    %c0_i32_21 = arith.constant 0 : i32
    %54 = arith.cmpi ne, %53, %c0_i32_21 : i32
    scf.if %54 {
      %c0_22 = arith.constant 0 : index
      %c0_23 = arith.constant 0 : index
      %55 = vector.load %arg5[%c0_22, %c0_23] : memref<8x128xf32, #tpu.memory_space<vmem>>, vector<8x128xf32>
      %56 = vector.shape_cast %55 : vector<8x128xf32> to vector<1x8x128xf32>
      %cst_24 = arith.constant dense<0.000000e+00> : vector<1xf32>
      %57 = vector.multi_reduction <add>, %56, %cst_24 [1, 2] : vector<1x8x128xf32> to vector<1xf32>
      %58 = vector.shape_cast %57 : vector<1xf32> to vector<1x1x1xf32>
      %59 = vector.extract %58[0, 0, 0] : f32 from vector<1x1x1xf32>
      %60 = vector.broadcast %59 : f32 to vector<1x1x1xf32>
      %c0_25 = arith.constant 0 : index
      %c0_26 = arith.constant 0 : index
      %c0_27 = arith.constant 0 : index
      %61 = vector.load %arg4[%c0_25, %c0_26, %c0_27] : memref<1x1x1xf32, #tpu.memory_space<vmem>>, vector<1x1x1xf32>
      tpu.vector_store %arg4[%c0_25, %c0_26, %c0_27], %60 {strides = array<i32>} : memref<1x1x1xf32, #tpu.memory_space<vmem>>, vector<1x1x1xf32>,
    } else {
    }
    return
  }
  func.func @transform_0(%arg0: i32, %arg1: i32) -> (i32, i32, i32) {
    %c1_i32 = arith.constant 1 : i32
    %0 = arith.muli %arg0, %c1_i32 : i32
    %1 = arith.addi %0, %arg1 : i32
    %c0_i32 = arith.constant 0 : i32
    %c0_i32_0 = arith.constant 0 : i32
    %c0_i32_1 = arith.constant 0 : i32
    return %c0_i32, %1, %c0_i32_0 : i32, i32, i32
  }
  func.func @transform_1(%arg0: i32, %arg1: i32) -> (i32, i32) {
    %c1_i32 = arith.constant 1 : i32
    %0 = arith.muli %arg0, %c1_i32 : i32
    %1 = arith.addi %0, %arg1 : i32
    %c0_i32 = arith.constant 0 : i32
    %c0_i32_0 = arith.constant 0 : i32
    return %1, %c0_i32 : i32, i32
  }
  func.func @transform_2(%arg0: i32, %arg1: i32) -> (i32, i32, i32) {
    %c0_i32 = arith.constant 0 : i32
    %c0_i32_0 = arith.constant 0 : i32
    %c0_i32_1 = arith.constant 0 : i32
    return %arg0, %c0_i32, %c0_i32_0 : i32, i32, i32
  }
}

</mosaic_0001>

<bundles_post_ra>
// kernel: tpu_custom_call.1
= control target key start
LH: loop header
LB: loop body
LE: loop exit
PB: predicated region body
PF: predicated region fallthrough
CT: control target
= control target key end

     0   :  { %7 = vsyncpa [#allocation4], 0  ;;  %s277_s0 = inlined_call_operand.hbm [shape: f32[3,8,128], index: 0, kind: input, shape index: {}]   ;;  %s278_s1 = inlined_call_operand.hbm [shape: s32[8,128], index: 1, kind: input, shape index: {}]   ;;  %s279_s2 = inlined_call_operand.hbm [shape: f32[1,1,1], index: 2, kind: output, shape index: {}]  }
   0x1   :  { %8 = vsyncpa [#allocation7], 0 }
   0x2   :  { %9 = vsyncpa [#allocation5], 0  ;;  %s17_s11 = sshll.u32 %s277_s0, 4  ;;  %s241_s12 = smov [#allocation3]   ;;  %s18_s11 = int_to_ptr.hbm [resolvable:$true] %s17_s11 }
   0x3   :  { %s19_s13 = sshll.u32 %s241_s12, 4  ;;  %s34_s16 = sshll.u32 %s278_s1, 4  ;;  %s20_s13 = int_to_ptr.vmem [resolvable:$true] %s19_s13  ;;  %s35_s16 = int_to_ptr.hbm [resolvable:$true] %s34_s16 }
   0x4   :  { %s242_s17 = smov 128   ;;  %s243_s18 = smov 8  }
   0x5   :  { %25 = dma.hbm_to_vmem [thread:$0]  %s18_s11, 384, %s20_s13, [#allocation4], %s242_s17, %s242_s17, %s243_s18  }
   0x6   :  { %s244_s19 = smov [#allocation6]  }
   0x7   :  { %s36_s20 = sshll.u32 %s244_s19, 4  ;;  %s37_s20 = int_to_ptr.vmem [resolvable:$true] %s36_s20 }
   0x8   :  { %39 = dma.hbm_to_vmem [thread:$0]  %s35_s16, 128, %s37_s20, [#allocation7]  }
   0x9   :  { %235 = dma.done.wait [#allocation4], 384  }
   0xa   :  { %236 = vsyncadd [#allocation4], 4294966912 }
   0xb   :  { %237 = dma.done.wait [#allocation7], 128  }
   0xc   :  { %238 = vsyncadd [#allocation7], 4294967168  ;;  %v56_v0 = vld [vmem:[#allocation3] sm:$0xff]  ;;  %v58_v1 = vld [vmem:[#allocation3 + $0x8] sm:$0xff]  ;;  %v245_v25 = vmov 0.001  }
   0xd   :  { %v60_v2 = vld [vmem:[#allocation3 + $0x10] sm:$0xff]  ;;  %v61_v3 = vmax.f32 %v56_v0, %v58_v1  ;;  %v55_v16 = vld [vmem:[#allocation6] sm:$0xff]  ;;  %s246_s0 = smov [#allocation8]   ;;  %s134_s23 = sshll.u32 %s279_s2, 4  ;;  %vm125_vm7 = vcmask 0   ;;  %s135_s23 = int_to_ptr.hbm [resolvable:$true] %s134_s23 }
   0xe   :  { %vm76_vm0 = vcmp.eq.s32.totalorder %v55_v16, 1  ;;  %vm80_vm3 = vcmp.eq.s32.totalorder %v55_v16, 2  ;;  %vm105_vm6 = vcmp.ge.s32.totalorder %v55_v16, 0  ;;  %s132_s1 = sshll.u32 %s246_s0, 4  ;;  %s133_s1 = int_to_ptr.vmem [resolvable:$true] %s132_s1 }
   0xf   :  { %v62_v4 = vmax.f32 %v61_v3, %v60_v2  ;;  %v79_v26 = vsel %vm76_vm0, 0.999, %v245_v25 }
  0x10   :  { %v83_v32 = vsel %vm80_vm3, 0.999, %v79_v26 }
  0x11   :  { %v63_v5 = vsub.f32 %v56_v0, %v62_v4  ;;  %v64_v6 = vsub.f32 %v58_v1, %v62_v4  ;;  %v65_v7 = vsub.f32 %v60_v2, %v62_v4  ;;  %v102_v38 = vsub.f32 0.0, %v83_v32 }
  0x13   :  { %v66_v8 = vmul.f32 1.442695, %v63_v5  ;;  %v68_v9 = vmul.f32 1.442695, %v64_v6  ;;  %v70_v10 = vmul.f32 1.442695, %v65_v7  ;;  %v77_v30 = vsel %vm76_vm0, %v64_v6, %v63_v5 }
  0x14   :  { %v81_v36 = vsel %vm80_vm3, %v65_v7, %v77_v30 }
  0x15   :  { %153 = vpow2.f32 %v66_v8 }
  0x16   :  { %155 = vpow2.f32 %v68_v9 }
  0x17   :  { %157 = vpow2.f32 %v70_v10 }
  0x1b   :  { %v154_v11 = vpop.eup %153 }
  0x1c   :  { %v156_v12 = vpop.eup %155 }
  0x1d   :  { %v158_v13 = vpop.eup %157  ;;  %v72_v14 = vadd.f32 %v156_v12, %v154_v11  ;;  %v78_v22 = vsel %vm76_vm0, %v156_v12, %v154_v11 }
  0x1e   :  { %v82_v29 = vsel %vm80_vm3, %v158_v13, %v78_v22 }
  0x1f   :  { %v73_v15 = vadd.f32 %v158_v13, %v72_v14 }
  0x21   :  { %159 = vrcp.f32 %v73_v15  ;;  %v96_v19 = vand.u32 2147483648, %v73_v15  ;;  %vm90_vm1 = vweird.f32 %v73_v15  ;;  %v94_v21 = vand.u32 2147483647, %v73_v15 }
  0x22   :  { %161 = vlog2.f32 %v73_v15 }
  0x23   :  { %v97_v24 = vor.u32 1.1754944e-38, %v96_v19  ;;  %vm95_vm5 = vcmp.eq.f32.partialorder %v94_v21, 8.507059e+37 }
  0x27   :  { %v160_v17 = vpop.eup %159 }
  0x28   :  { %v86_v18 = vmul.f32 %v160_v17, %v73_v15  ;;  %vm91_vm2 = vweird.f32 %v160_v17  ;;  %v162_v28 = vpop.eup %161 }
  0x29   :  { %vm92_vm4 = vmor %vm90_vm1, %vm91_vm2  ;;  %v75_v34 = vmul.f32 0.6931472, %v162_v28 }
  0x2a   :  { %v87_v20 = vsub.f32 1.0, %v86_v18 }
  0x2b   :  { %v84_v39 = vsub.f32 %v81_v36, %v75_v34 }
  0x2c   :  { %v88_v23 = vmul.f32 %v160_v17, %v87_v20 }
  0x2e   :  { %v89_v27 = vadd.f32 %v160_v17, %v88_v23 }
  0x30   :  { %v93_v31 = vsel %vm92_vm4, %v160_v17, %v89_v27 }
  0x31   :  { %v98_v33 = vsel %vm95_vm5, %v97_v24, %v93_v31 }
  0x32   :  { %v99_v35 = vmul.f32 %v98_v33, %v82_v29 }
  0x34   :  { %v100_v37 = vsub.f32 1.0, %v99_v35 }
  0x36   :  { %v101_v40 = vmul.f32 %v100_v37, %v100_v37 }
  0x38   :  { %v103_v41 = vmul.f32 %v102_v38, %v101_v40 }
  0x3a   :  { %v104_v42 = vmul.f32 %v103_v41, %v84_v39 }
  0x3c   :  { %v106_v43 = vsel %vm105_vm6, %v104_v42, 0.0 }
  0x3d   :  { %115 = vadd.xlane.f32.xlu0 %v106_v43 }
  0xb0   :  { %v116_v44 = vpop.xlane.xlu0 %115 }
  0xb1   :  { %v117_v45 = vrot.slane %v116_v44, 4 }
  0xb3   :  { %v118_v46 = vadd.f32 %v117_v45, %v116_v44 }
  0xb5   :  { %v119_v47 = vrot.slane %v118_v46, 2 }
  0xb7   :  { %v120_v48 = vadd.f32 %v119_v47, %v118_v46 }
  0xb9   :  { %v121_v49 = vrot.slane %v120_v48, 1 }
  0xbb   :  { %v122_v50 = vadd.f32 %v121_v49, %v120_v48 }
  0xbd   :  { %145 = vpush %v122_v50 }
  0xee   :  { %s146_s24 = spop %145 }
  0xef   :  { %v124_v51 = vstv %s146_s24 }
  0xf0   :  { %126 = vst.msk [vmem:[#allocation8] sm:$0x1] %vm125_vm7, %v124_v51 }
  0xf1   :  { %137 = dma.vmem_to_hbm [thread:$0]  %s133_s1, 16, %s135_s23, [#allocation5]  }
  0xf2   :  { %239 = dma.done.wait [#allocation5], 16  }
  0xf3   :  { %240 = vsyncadd [#allocation5], 4294967280 }
  0xf4   :  { %142 = vsyncpa [#allocation4], 1 }
  0xf5   :  { %143 = vsyncpa [#allocation7], 1 }
  0xf6   :  { %144 = vsyncpa [#allocation5], 1 }

</bundles_post_ra>
